<compile_context>
chip_gen: v7x
topology: tpu7x:2x2x1
jax: 0.10.0
libtpu: 0.0.40
codegen_flags: <defaults>
</compile_context>

<pallas_src>
import functools

import jax
import jax.numpy as jnp
from jax.experimental import pallas as pl
from jax.experimental.pallas import tpu as pltpu

# Layer sizes from the PyTorch module and their storage-padded counterparts.
LAYER_DIMS = [6, 100, 250, 500, 250, 100, 50, 1]
PAD_DIMS = [8, 128, 256, 512, 256, 128, 128, 1]

# Rows per grid step for large batches (sweepable; ~a few MiB of VMEM live).
TILE_B = 1024


def _round_up(n, m):
    return ((n + m - 1) // m) * m


def _chain(x_blk, ws, bs):
    """Run the full 7-layer MLP on one row-chunk: (rows, 8) f32 -> (rows, 1) f32."""
    # Layer 0 (`self.input`, 6->100): f32 matmul (K=8 is tiny), NO activation.
    h = jnp.dot(x_blk, ws[0][...], preferred_element_type=jnp.float32)
    h = (h + bs[0][...]).astype(jnp.bfloat16)

    # Layers 1..5 (first_hidden .. fifth_hidden): Linear + ReLU.
    for li in range(1, 6):
        acc = jnp.dot(h, ws[li][...], preferred_element_type=jnp.float32)
        acc = acc + bs[li][...]                      # bias add in f32
        if li < 5:
            h = jnp.maximum(acc.astype(jnp.bfloat16), 0)   # bf16 ReLU epilogue
        else:
            h = jnp.maximum(acc, 0.0)                # keep f32: feeds output layer

    # Layer 6 (`self.output`, 50->1): dense lane reduction instead of a padded
    # (rows, 128) matmul + 128-lane f32 store.  Padded lanes of h and ws[6]
    # are exactly zero, so the reduction is exact.
    prod = h * ws[6][...]                            # (rows, 128) * (1, 128)
    return jnp.sum(prod, axis=-1, keepdims=True) + bs[6][...]


def _mlp_kernel(x_ref,
                w1, b1, w2, b2, w3, b3, w4, b4, w5, b5, w6, b6, w7, b7,
                o_ref, *, n_chunks, rows_per_chunk):
    ws = (w1, w2, w3, w4, w5, w6, w7)
    bs = (b1, b2, b3, b4, b5, b6, b7)
    # Independent row-chunks give the scheduler MXU/VALU work to co-issue.
    for c in range(n_chunks):
        lo = c * rows_per_chunk
        res = _chain(x_ref[lo:lo + rows_per_chunk, :], ws, bs)
        o_ref[lo:lo + rows_per_chunk, :] = res


@functools.partial(jax.jit, static_argnames=("tile_b", "n_chunks"))
def _forward_impl(x, params, *, tile_b, n_chunks):
    batch = x.shape[0]
    b_pad = _round_up(batch, tile_b)

    # Pad only to (b_pad, 8) f32 (~32 B/row) — no 128-lane bf16 slab.
    x_p = jnp.zeros((b_pad, PAD_DIMS[0]), jnp.float32)
    x_p = x_p.at[:batch, :LAYER_DIMS[0]].set(x.astype(jnp.float32))

    flat = []
    in_specs = [pl.BlockSpec((tile_b, PAD_DIMS[0]), lambda i: (i, 0))]
    for w, b in params:
        flat.extend([w, b])
        # Constant block index => weights/biases stay resident in VMEM.
        in_specs.append(pl.BlockSpec(w.shape, lambda i: (0, 0)))
        in_specs.append(pl.BlockSpec(b.shape, lambda i: (0, 0)))

    kernel = functools.partial(_mlp_kernel, n_chunks=n_chunks,
                               rows_per_chunk=tile_b // n_chunks)

    out = pl.pallas_call(
        kernel,
        out_shape=jax.ShapeDtypeStruct((b_pad, 1), jnp.float32),
        grid=(b_pad // tile_b,),
        in_specs=in_specs,
        out_specs=pl.BlockSpec((tile_b, 1), lambda i: (i, 0)),
        compiler_params=pltpu.CompilerParams(
            dimension_semantics=("parallel",),
        ),
    )(x_p, *flat)

    return out[:batch]


def network_forward(x, params, *, tile_b=None):
    """x: (B, 6) float32. params: list of 7 (padded W, padded b) pairs (see init_params)."""
    batch = x.shape[0]
    if tile_b is None:
        # Small batches: shrink the tile to the (8-rounded) batch so we don't
        # pad up to 1024 rows of wasted MXU/VPU/DMA work.
        tile_b = min(TILE_B, _round_up(max(batch, 1), 8))
    # Interleave two row-chunks only when the tile is big enough for aligned halves.
    n_chunks = 2 if (tile_b % 16 == 0 and tile_b >= 128) else 1
    return _forward_impl(x, params, tile_b=tile_b, n_chunks=n_chunks)


def init_params(key):
    """Deterministic init mimicking PyTorch Linear default (uniform +-1/sqrt(fan_in)).

    Storage layout (padded rows/cols/lanes are exactly 0 — required invariant):
      layer 0: W (8, 128) f32, b (1, 128) f32        (f32 first matmul)
      layers 1..5: W (in_pad, out_pad) bf16, b (1, out_pad) f32
      layer 6: W stored as a (1, 128) f32 lane vector, b (1, 1) f32
    """
    params = []
    for i in range(7):
        fan_in, fan_out = LAYER_DIMS[i], LAYER_DIMS[i + 1]
        key, kw, kb = jax.random.split(key, 3)
        bound = float(fan_in) ** -0.5
        w = jax.random.uniform(kw, (fan_in, fan_out), jnp.float32, -bound, bound)
        b = jax.random.uniform(kb, (fan_out,), jnp.float32, -bound, bound)
        if i == 0:
            w_p = jnp.zeros((PAD_DIMS[0], PAD_DIMS[1]), jnp.float32)
            w_p = w_p.at[:fan_in, :fan_out].set(w)
            b_p = jnp.zeros((1, PAD_DIMS[1]), jnp.float32).at[0, :fan_out].set(b)
        elif i == 6:
            w_p = jnp.zeros((1, PAD_DIMS[6]), jnp.float32).at[0, :fan_in].set(w[:, 0])
            b_p = jnp.zeros((1, 1), jnp.float32).at[0, 0].set(b[0])
        else:
            p_in, p_out = PAD_DIMS[i], PAD_DIMS[i + 1]
            w_p = jnp.zeros((p_in, p_out), jnp.bfloat16)
            w_p = w_p.at[:fan_in, :fan_out].set(w.astype(jnp.bfloat16))
            b_p = jnp.zeros((1, p_out), jnp.float32).at[0, :fan_out].set(b)
        params.append((w_p, b_p))
    return params


def reference_forward(x, params):
    """Plain-JAX reference replicating the kernel's mixed-precision math."""
    batch = x.shape[0]
    h = jnp.zeros((batch, PAD_DIMS[0]), jnp.float32)
    h = h.at[:, :LAYER_DIMS[0]].set(x.astype(jnp.float32))
    w1, b1 = params[0]
    h = (jnp.dot(h, w1, preferred_element_type=jnp.float32) + b1).astype(jnp.bfloat16)
    for li in range(1, 6):
        w, b = params[li]
        acc = jnp.dot(h, w, preferred_element_type=jnp.float32) + b
        h = jnp.maximum(acc.astype(jnp.bfloat16), 0) if li < 5 else jnp.maximum(acc, 0.0)
    w7, b7 = params[6]
    return jnp.sum(h * w7, axis=-1, keepdims=True) + b7


if __name__ == "__main__":
    key = jax.random.PRNGKey(0)
    kx, kp = jax.random.split(key)
    params = init_params(kp)

    # Small batch: single tiny tile (no 1024-row padding waste).
    x_small = jax.random.normal(kx, (8, LAYER_DIMS[0]), jnp.float32)
    out_small = jax.block_until_ready(network_forward(x_small, params))
    ref_small = reference_forward(x_small, params)
    assert out_small.shape == (8, 1), out_small.shape
    assert jnp.allclose(out_small, ref_small, atol=2e-2, rtol=2e-2), (
        "small-batch mismatch", out_small, ref_small)

    # Batch that exercises batch padding (300 -> 304) and the 2-chunk interleave.
    x_big = jax.random.normal(jax.random.PRNGKey(1), (300, LAYER_DIMS[0]), jnp.float32)
    out_big = jax.block_until_ready(network_forward(x_big, params))
    ref_big = reference_forward(x_big, params)
    assert out_big.shape == (300, 1), out_big.shape
    assert jnp.allclose(out_big, ref_big, atol=2e-2, rtol=2e-2), (
        "padded-batch mismatch", out_big, ref_big)

    print("KERNEL_OK")
</pallas_src>

<mosaic_0001>
module attributes {stable_mosaic.version = 11 : i64} {
  func.func @_mlp_kernel(%arg0: i32, %arg1: memref<8x8xf32, #tpu.memory_space<vmem>>, %arg2: memref<8x128xf32, #tpu.memory_space<vmem>>, %arg3: memref<1x128xf32, #tpu.memory_space<vmem>>, %arg4: memref<128x256xbf16, #tpu.memory_space<vmem>>, %arg5: memref<1x256xf32, #tpu.memory_space<vmem>>, %arg6: memref<256x512xbf16, #tpu.memory_space<vmem>>, %arg7: memref<1x512xf32, #tpu.memory_space<vmem>>, %arg8: memref<512x256xbf16, #tpu.memory_space<vmem>>, %arg9: memref<1x256xf32, #tpu.memory_space<vmem>>, %arg10: memref<256x128xbf16, #tpu.memory_space<vmem>>, %arg11: memref<1x128xf32, #tpu.memory_space<vmem>>, %arg12: memref<128x128xbf16, #tpu.memory_space<vmem>>, %arg13: memref<1x128xf32, #tpu.memory_space<vmem>>, %arg14: memref<1x128xf32, #tpu.memory_space<vmem>>, %arg15: memref<1x1xf32, #tpu.memory_space<vmem>>, %arg16: memref<8x1xf32, #tpu.memory_space<vmem>>) attributes {dimension_semantics = [#tpu.dimension_semantics<parallel>], iteration_bounds = array<i64: 1>, scalar_prefetch = 0 : i64, scratch_operands = 0 : i64, tpu.core_type = #tpu.core_type<tc>, window_params = [{transform_indices = @transform_0, window_bounds = array<i64: 8, 8>}, {pipeline_mode = #tpu.pipeline_mode<synchronous>, transform_indices = @transform_1, window_bounds = array<i64: 8, 128>}, {pipeline_mode = #tpu.pipeline_mode<synchronous>, transform_indices = @transform_2, window_bounds = array<i64: 1, 128>}, {pipeline_mode = #tpu.pipeline_mode<synchronous>, transform_indices = @transform_3, window_bounds = array<i64: 128, 256>}, {pipeline_mode = #tpu.pipeline_mode<synchronous>, transform_indices = @transform_4, window_bounds = array<i64: 1, 256>}, {pipeline_mode = #tpu.pipeline_mode<synchronous>, transform_indices = @transform_5, window_bounds = array<i64: 256, 512>}, {pipeline_mode = #tpu.pipeline_mode<synchronous>, transform_indices = @transform_6, window_bounds = array<i64: 1, 512>}, {pipeline_mode = #tpu.pipeline_mode<synchronous>, transform_indices = @transform_7, window_bounds = array<i64: 512, 256>}, {pipeline_mode = #tpu.pipeline_mode<synchronous>, transform_indices = @transform_8, window_bounds = array<i64: 1, 256>}, {pipeline_mode = #tpu.pipeline_mode<synchronous>, transform_indices = @transform_9, window_bounds = array<i64: 256, 128>}, {pipeline_mode = #tpu.pipeline_mode<synchronous>, transform_indices = @transform_10, window_bounds = array<i64: 1, 128>}, {pipeline_mode = #tpu.pipeline_mode<synchronous>, transform_indices = @transform_11, window_bounds = array<i64: 128, 128>}, {pipeline_mode = #tpu.pipeline_mode<synchronous>, transform_indices = @transform_12, window_bounds = array<i64: 1, 128>}, {pipeline_mode = #tpu.pipeline_mode<synchronous>, transform_indices = @transform_13, window_bounds = array<i64: 1, 128>}, {pipeline_mode = #tpu.pipeline_mode<synchronous>, transform_indices = @transform_14, window_bounds = array<i64: 1, 1>}, {transform_indices = @transform_15, window_bounds = array<i64: 8, 1>}]} {
    %c0 = arith.constant 0 : index
    %c0_0 = arith.constant 0 : index
    %0 = vector.load %arg1[%c0, %c0_0] : memref<8x8xf32, #tpu.memory_space<vmem>>, vector<8x8xf32>
    %c0_1 = arith.constant 0 : index
    %c0_2 = arith.constant 0 : index
    %1 = vector.load %arg2[%c0_1, %c0_2] : memref<8x128xf32, #tpu.memory_space<vmem>>, vector<8x128xf32>
    %cst = arith.constant dense<0.000000e+00> : vector<8x128xf32>
    %2 = tpu.matmul %0, %1, %cst {dimension_numbers = #tpu.dot_dimension_numbers<[1], [0], [0], [1], [0, 0, 1, 1], [], []>} : vector<8x8xf32>, vector<8x128xf32>, vector<8x128xf32> -> vector<8x128xf32>
    %c0_3 = arith.constant 0 : index
    %c0_4 = arith.constant 0 : index
    %3 = vector.load %arg3[%c0_3, %c0_4] : memref<1x128xf32, #tpu.memory_space<vmem>>, vector<1x128xf32>
    %4 = vector.broadcast %3 : vector<1x128xf32> to vector<8x128xf32>
    %5 = arith.addf %2, %4 : vector<8x128xf32>
    %6 = arith.truncf %5 : vector<8x128xf32> to vector<8x128xbf16>
    %c0_5 = arith.constant 0 : index
    %c0_6 = arith.constant 0 : index
    %7 = vector.load %arg4[%c0_5, %c0_6] : memref<128x256xbf16, #tpu.memory_space<vmem>>, vector<128x256xbf16>
    %cst_7 = arith.constant dense<0.000000e+00> : vector<8x256xf32>
    %8 = tpu.matmul %6, %7, %cst_7 {dimension_numbers = #tpu.dot_dimension_numbers<[1], [0], [0], [1], [0, 0, 1, 1], [], []>} : vector<8x128xbf16>, vector<128x256xbf16>, vector<8x256xf32> -> vector<8x256xf32>
    %c0_8 = arith.constant 0 : index
    %c0_9 = arith.constant 0 : index
    %9 = vector.load %arg5[%c0_8, %c0_9] : memref<1x256xf32, #tpu.memory_space<vmem>>, vector<1x256xf32>
    %10 = vector.broadcast %9 : vector<1x256xf32> to vector<8x256xf32>
    %11 = arith.addf %8, %10 : vector<8x256xf32>
    %12 = arith.truncf %11 : vector<8x256xf32> to vector<8x256xbf16>
    %cst_10 = arith.constant 0.000000e+00 : bf16
    %13 = vector.broadcast %cst_10 : bf16 to vector<8x256xbf16>
    %14 = arith.maximumf %12, %13 : vector<8x256xbf16>
    %c0_11 = arith.constant 0 : index
    %c0_12 = arith.constant 0 : index
    %15 = vector.load %arg6[%c0_11, %c0_12] : memref<256x512xbf16, #tpu.memory_space<vmem>>, vector<256x512xbf16>
    %cst_13 = arith.constant dense<0.000000e+00> : vector<8x512xf32>
    %16 = tpu.matmul %14, %15, %cst_13 {dimension_numbers = #tpu.dot_dimension_numbers<[1], [0], [0], [1], [0, 0, 1, 1], [], []>} : vector<8x256xbf16>, vector<256x512xbf16>, vector<8x512xf32> -> vector<8x512xf32>
    %c0_14 = arith.constant 0 : index
    %c0_15 = arith.constant 0 : index
    %17 = vector.load %arg7[%c0_14, %c0_15] : memref<1x512xf32, #tpu.memory_space<vmem>>, vector<1x512xf32>
    %18 = vector.broadcast %17 : vector<1x512xf32> to vector<8x512xf32>
    %19 = arith.addf %16, %18 : vector<8x512xf32>
    %20 = arith.truncf %19 : vector<8x512xf32> to vector<8x512xbf16>
    %cst_16 = arith.constant 0.000000e+00 : bf16
    %21 = vector.broadcast %cst_16 : bf16 to vector<8x512xbf16>
    %22 = arith.maximumf %20, %21 : vector<8x512xbf16>
    %c0_17 = arith.constant 0 : index
    %c0_18 = arith.constant 0 : index
    %23 = vector.load %arg8[%c0_17, %c0_18] : memref<512x256xbf16, #tpu.memory_space<vmem>>, vector<512x256xbf16>
    %cst_19 = arith.constant dense<0.000000e+00> : vector<8x256xf32>
    %24 = tpu.matmul %22, %23, %cst_19 {dimension_numbers = #tpu.dot_dimension_numbers<[1], [0], [0], [1], [0, 0, 1, 1], [], []>} : vector<8x512xbf16>, vector<512x256xbf16>, vector<8x256xf32> -> vector<8x256xf32>
    %c0_20 = arith.constant 0 : index
    %c0_21 = arith.constant 0 : index
    %25 = vector.load %arg9[%c0_20, %c0_21] : memref<1x256xf32, #tpu.memory_space<vmem>>, vector<1x256xf32>
    %26 = vector.broadcast %25 : vector<1x256xf32> to vector<8x256xf32>
    %27 = arith.addf %24, %26 : vector<8x256xf32>
    %28 = arith.truncf %27 : vector<8x256xf32> to vector<8x256xbf16>
    %cst_22 = arith.constant 0.000000e+00 : bf16
    %29 = vector.broadcast %cst_22 : bf16 to vector<8x256xbf16>
    %30 = arith.maximumf %28, %29 : vector<8x256xbf16>
    %c0_23 = arith.constant 0 : index
    %c0_24 = arith.constant 0 : index
    %31 = vector.load %arg10[%c0_23, %c0_24] : memref<256x128xbf16, #tpu.memory_space<vmem>>, vector<256x128xbf16>
    %cst_25 = arith.constant dense<0.000000e+00> : vector<8x128xf32>
    %32 = tpu.matmul %30, %31, %cst_25 {dimension_numbers = #tpu.dot_dimension_numbers<[1], [0], [0], [1], [0, 0, 1, 1], [], []>} : vector<8x256xbf16>, vector<256x128xbf16>, vector<8x128xf32> -> vector<8x128xf32>
    %c0_26 = arith.constant 0 : index
    %c0_27 = arith.constant 0 : index
    %33 = vector.load %arg11[%c0_26, %c0_27] : memref<1x128xf32, #tpu.memory_space<vmem>>, vector<1x128xf32>
    %34 = vector.broadcast %33 : vector<1x128xf32> to vector<8x128xf32>
    %35 = arith.addf %32, %34 : vector<8x128xf32>
    %36 = arith.truncf %35 : vector<8x128xf32> to vector<8x128xbf16>
    %cst_28 = arith.constant 0.000000e+00 : bf16
    %37 = vector.broadcast %cst_28 : bf16 to vector<8x128xbf16>
    %38 = arith.maximumf %36, %37 : vector<8x128xbf16>
    %c0_29 = arith.constant 0 : index
    %c0_30 = arith.constant 0 : index
    %39 = vector.load %arg12[%c0_29, %c0_30] : memref<128x128xbf16, #tpu.memory_space<vmem>>, vector<128x128xbf16>
    %cst_31 = arith.constant dense<0.000000e+00> : vector<8x128xf32>
    %40 = tpu.matmul %38, %39, %cst_31 {dimension_numbers = #tpu.dot_dimension_numbers<[1], [0], [0], [1], [0, 0, 1, 1], [], []>} : vector<8x128xbf16>, vector<128x128xbf16>, vector<8x128xf32> -> vector<8x128xf32>
    %c0_32 = arith.constant 0 : index
    %c0_33 = arith.constant 0 : index
    %41 = vector.load %arg13[%c0_32, %c0_33] : memref<1x128xf32, #tpu.memory_space<vmem>>, vector<1x128xf32>
    %42 = vector.broadcast %41 : vector<1x128xf32> to vector<8x128xf32>
    %43 = arith.addf %40, %42 : vector<8x128xf32>
    %cst_34 = arith.constant 0.000000e+00 : f32
    %44 = vector.broadcast %cst_34 : f32 to vector<8x128xf32>
    %45 = arith.maximumf %43, %44 : vector<8x128xf32>
    %c0_35 = arith.constant 0 : index
    %c0_36 = arith.constant 0 : index
    %46 = vector.load %arg14[%c0_35, %c0_36] : memref<1x128xf32, #tpu.memory_space<vmem>>, vector<1x128xf32>
    %47 = vector.broadcast %46 : vector<1x128xf32> to vector<8x128xf32>
    %48 = arith.mulf %45, %47 : vector<8x128xf32>
    %cst_37 = arith.constant dense<0.000000e+00> : vector<8xf32>
    %49 = vector.multi_reduction <add>, %48, %cst_37 [1] : vector<8x128xf32> to vector<8xf32>
    %50 = vector.shape_cast %49 : vector<8xf32> to vector<8x1xf32>
    %c0_38 = arith.constant 0 : index
    %c0_39 = arith.constant 0 : index
    %51 = vector.load %arg15[%c0_38, %c0_39] : memref<1x1xf32, #tpu.memory_space<vmem>>, vector<1x1xf32>
    %52 = vector.broadcast %51 : vector<1x1xf32> to vector<8x1xf32>
    %53 = arith.addf %50, %52 : vector<8x1xf32>
    %c0_40 = arith.constant 0 : index
    %c0_41 = arith.constant 0 : index
    %54 = vector.load %arg16[%c0_40, %c0_41] : memref<8x1xf32, #tpu.memory_space<vmem>>, vector<8x1xf32>
    tpu.vector_store %arg16[%c0_40, %c0_41], %53 {strides = array<i32>} : memref<8x1xf32, #tpu.memory_space<vmem>>, vector<8x1xf32>,
    return
  }
  func.func @transform_0(%arg0: i32) -> (i32, i32) {
    %c0_i32 = arith.constant 0 : i32
    %c0_i32_0 = arith.constant 0 : i32
    return %arg0, %c0_i32 : i32, i32
  }
  func.func @transform_1(%arg0: i32) -> (i32, i32) {
    %c0_i32 = arith.constant 0 : i32
    %c0_i32_0 = arith.constant 0 : i32
    %c0_i32_1 = arith.constant 0 : i32
    return %c0_i32, %c0_i32_0 : i32, i32
  }
  func.func @transform_2(%arg0: i32) -> (i32, i32) {
    %c0_i32 = arith.constant 0 : i32
    %c0_i32_0 = arith.constant 0 : i32
    %c0_i32_1 = arith.constant 0 : i32
    return %c0_i32, %c0_i32_0 : i32, i32
  }
  func.func @transform_3(%arg0: i32) -> (i32, i32) {
    %c0_i32 = arith.constant 0 : i32
    %c0_i32_0 = arith.constant 0 : i32
    %c0_i32_1 = arith.constant 0 : i32
    return %c0_i32, %c0_i32_0 : i32, i32
  }
  func.func @transform_4(%arg0: i32) -> (i32, i32) {
    %c0_i32 = arith.constant 0 : i32
    %c0_i32_0 = arith.constant 0 : i32
    %c0_i32_1 = arith.constant 0 : i32
    return %c0_i32, %c0_i32_0 : i32, i32
  }
  func.func @transform_5(%arg0: i32) -> (i32, i32) {
    %c0_i32 = arith.constant 0 : i32
    %c0_i32_0 = arith.constant 0 : i32
    %c0_i32_1 = arith.constant 0 : i32
    return %c0_i32, %c0_i32_0 : i32, i32
  }
  func.func @transform_6(%arg0: i32) -> (i32, i32) {
    %c0_i32 = arith.constant 0 : i32
    %c0_i32_0 = arith.constant 0 : i32
    %c0_i32_1 = arith.constant 0 : i32
    return %c0_i32, %c0_i32_0 : i32, i32
  }
  func.func @transform_7(%arg0: i32) -> (i32, i32) {
    %c0_i32 = arith.constant 0 : i32
    %c0_i32_0 = arith.constant 0 : i32
    %c0_i32_1 = arith.constant 0 : i32
    return %c0_i32, %c0_i32_0 : i32, i32
  }
  func.func @transform_8(%arg0: i32) -> (i32, i32) {
    %c0_i32 = arith.constant 0 : i32
    %c0_i32_0 = arith.constant 0 : i32
    %c0_i32_1 = arith.constant 0 : i32
    return %c0_i32, %c0_i32_0 : i32, i32
  }
  func.func @transform_9(%arg0: i32) -> (i32, i32) {
    %c0_i32 = arith.constant 0 : i32
    %c0_i32_0 = arith.constant 0 : i32
    %c0_i32_1 = arith.constant 0 : i32
    return %c0_i32, %c0_i32_0 : i32, i32
  }
  func.func @transform_10(%arg0: i32) -> (i32, i32) {
    %c0_i32 = arith.constant 0 : i32
    %c0_i32_0 = arith.constant 0 : i32
    %c0_i32_1 = arith.constant 0 : i32
    return %c0_i32, %c0_i32_0 : i32, i32
  }
  func.func @transform_11(%arg0: i32) -> (i32, i32) {
    %c0_i32 = arith.constant 0 : i32
    %c0_i32_0 = arith.constant 0 : i32
    %c0_i32_1 = arith.constant 0 : i32
    return %c0_i32, %c0_i32_0 : i32, i32
  }
  func.func @transform_12(%arg0: i32) -> (i32, i32) {
    %c0_i32 = arith.constant 0 : i32
    %c0_i32_0 = arith.constant 0 : i32
    %c0_i32_1 = arith.constant 0 : i32
    return %c0_i32, %c0_i32_0 : i32, i32
  }
  func.func @transform_13(%arg0: i32) -> (i32, i32) {
    %c0_i32 = arith.constant 0 : i32
    %c0_i32_0 = arith.constant 0 : i32
    %c0_i32_1 = arith.constant 0 : i32
    return %c0_i32, %c0_i32_0 : i32, i32
  }
  func.func @transform_14(%arg0: i32) -> (i32, i32) {
    %c0_i32 = arith.constant 0 : i32
    %c0_i32_0 = arith.constant 0 : i32
    %c0_i32_1 = arith.constant 0 : i32
    return %c0_i32, %c0_i32_0 : i32, i32
  }
  func.func @transform_15(%arg0: i32) -> (i32, i32) {
    %c0_i32 = arith.constant 0 : i32
    %c0_i32_0 = arith.constant 0 : i32
    return %arg0, %c0_i32 : i32, i32
  }
}

</mosaic_0001>

<bundles_post_ra>
// kernel: _forward_impl.1
= control target key start
LH: loop header
LB: loop body
LE: loop exit
PB: predicated region body
PF: predicated region fallthrough
CT: control target
= control target key end

     0   :  { %s2477_s0 = inlined_call_operand.vmem [shape: f32[8,8], index: 0, kind: input, shape index: {}]   ;;  %s2478_s1 = inlined_call_operand.vmem [shape: f32[8,128], index: 1, kind: input, shape index: {}]   ;;  %s2479_s2 = inlined_call_operand.vmem [shape: f32[1,128], index: 2, kind: input, shape index: {}]   ;;  %s2480_s3 = inlined_call_operand.hbm [shape: bf16[128,256], index: 3, kind: input, shape index: {}]   ;;  %s2481_s4 = inlined_call_operand.vmem [shape: f32[1,256], index: 4, kind: input, shape index: {}]   ;;  %s2482_s5 = inlined_call_operand.hbm [shape: bf16[256,512], index: 5, kind: input, shape index: {}]   ;;  %s2483_s6 = inlined_call_operand.vmem [shape: f32[1,512], index: 6, kind: input, shape index: {}]   ;;  %s2484_s7 = inlined_call_operand.hbm [shape: bf16[512,256], index: 7, kind: input, shape index: {}]   ;;  %s2485_s8 = inlined_call_operand.vmem [shape: f32[1,256], index: 8, kind: input, shape index: {}]   ;;  %s2486_s9 = inlined_call_operand.hbm [shape: bf16[256,128], index: 9, kind: input, shape index: {}]   ;;  %s2487_s10 = inlined_call_operand.vmem [shape: f32[1,128], index: 10, kind: input, shape index: {}]   ;;  %s2488_s11 = inlined_call_operand.vmem [shape: bf16[128,128], index: 11, kind: input, shape index: {}]   ;;  %s2489_s12 = inlined_call_operand.vmem [shape: f32[1,128], index: 12, kind: input, shape index: {}]   ;;  %s2490_s13 = inlined_call_operand.vmem [shape: f32[1,128], index: 13, kind: input, shape index: {}]   ;;  %s2491_s14 = inlined_call_operand.<no memory space> [shape: f32[1,1], index: 14, kind: input, shape index: {}]   ;;  %s2492_s15 = inlined_call_operand.vmem [shape: f32[8,1], index: 15, kind: output, shape index: {}]  }
   0x1   :  { %v20_v0 = vstv %s2491_s14 }
   0x2   :  { %21 = vst [vmem:[#allocation2] sm:$0x1] %v20_v0 }
   0x3   :  { %22 = vsyncpa [#allocation4], 0 }
   0x4   :  { %23 = vsyncpa [#allocation6], 0 }
   0x5   :  { %24 = vsyncpa [#allocation9], 0  ;;  %s2224_s20 = smov [#allocation5]   ;;  %s2130_s24 = scalar_lea.hbm %s2482_s5, 8192 }
   0x6   :  { %s50_s21 = sshll.u32 %s2224_s20, 4  ;;  %p2131_p0 = scmp.ne.s32.totalorder %s2482_s5, %s2130_s24  ;;  %s51_s21 = int_to_ptr.vmem [resolvable:$true] %s50_s21 }
   0x7   :  { %p2134_p1 = scmp.lt.u32.totalorder %s2130_s24, %s2482_s5 }
   0x9   :  { %p2136_p2 = pnand %p2134_p1, %p2131_p0 }
   0xb   :  { %2139 = shalt.err (!%p2136_p2)
}
   0xc   :  { %s2140_s14 = scalar_lea.vmem %s51_s21, 8192  ;;  %p2145_p4 = scmp.lt.s32.totalorder %s51_s21, %s51_s21 }
   0xd   :  { %p2141_p3 = scmp.ne.s32.totalorder %s51_s21, %s2140_s14  ;;  %p2146_p5 = scmp.lt.s32.totalorder %s2140_s14, %s2140_s14 }
   0xf   :  { %p2147_p6 = por %p2146_p5, %p2145_p4 }
  0x11   :  { %p2148_p7 = pnand %p2147_p6, %p2141_p3 }
  0x13   :  { %2151 = shalt.err (!%p2148_p7)
}
  0x14   :  { %s2225_s29 = smov 256   ;;  %s2226_s30 = smov 16  }
  0x15   :  { %56 = dma.hbm_to_vmem [thread:$0]  %s2482_s5, 8192, %s51_s21, [#allocation6], %s2225_s29, %s2225_s29, %s2226_s30  }
  0x16   :  { %s2227_s18 = smov [#allocation3]   ;;  %s2152_s23 = scalar_lea.hbm %s2480_s3, 2048 }
  0x17   :  { %s36_s19 = sshll.u32 %s2227_s18, 4  ;;  %p2153_p8 = scmp.ne.s32.totalorder %s2480_s3, %s2152_s23  ;;  %s37_s19 = int_to_ptr.vmem [resolvable:$true] %s36_s19 }
  0x18   :  { %p2156_p9 = scmp.lt.u32.totalorder %s2152_s23, %s2480_s3 }
  0x1a   :  { %p2158_p10 = pnand %p2156_p9, %p2153_p8 }
  0x1c   :  { %2161 = shalt.err (!%p2158_p10)
}
  0x1d   :  { %s2162_s28 = scalar_lea.vmem %s37_s19, 2048  ;;  %p2167_p12 = scmp.lt.s32.totalorder %s37_s19, %s37_s19 }
  0x1e   :  { %p2163_p11 = scmp.ne.s32.totalorder %s37_s19, %s2162_s28  ;;  %p2168_p13 = scmp.lt.s32.totalorder %s2162_s28, %s2162_s28 }
  0x20   :  { %p2169_p0 = por %p2168_p13, %p2167_p12 }
  0x22   :  { %p2170_p1 = pnand %p2169_p0, %p2163_p11 }
  0x24   :  { %2173 = shalt.err (!%p2170_p1)
}
  0x25   :  { %s2228_s5 = smov 128   ;;  %s2229_s21 = smov 8  }
  0x26   :  { %42 = dma.hbm_to_vmem [thread:$0]  %s2480_s3, 2048, %s37_s19, [#allocation4], %s2228_s5, %s2228_s5, %s2229_s21  }
  0x27   :  { %s2230_s30 = smov [#allocation7]   ;;  %s2231_s17 = smov [#allocation8]  }
  0x28   :  { %s64_s16 = sshll.u32 %s2230_s30, 4  ;;  %s78_s18 = sshll.u32 %s2231_s17, 4  ;;  %s65_s16 = int_to_ptr.vmem [resolvable:$true] %s64_s16  ;;  %s2344_s18 = int_to_ptr.vmem [resolvable:$true] %s78_s18 }
  0x29   :  { %s2174_s23 = scalar_lea.hbm %s2484_s7, 8192 }
  0x2a   :  { %p2175_p2 = scmp.ne.s32.totalorder %s2484_s7, %s2174_s23  ;;  %p2178_p3 = scmp.lt.u32.totalorder %s2174_s23, %s2484_s7 }
  0x2c   :  { %p2180_p4 = pnand %p2178_p3, %p2175_p2 }
  0x2e   :  { %2183 = shalt.err (!%p2180_p4)
}
  0x2f   :  { %s2184_s3 = scalar_lea.vmem %s65_s16, 8192  ;;  %p2189_p6 = scmp.lt.s32.totalorder %s65_s16, %s65_s16 }
  0x30   :  { %p2185_p5 = scmp.ne.s32.totalorder %s65_s16, %s2184_s3  ;;  %p2190_p7 = scmp.lt.s32.totalorder %s2184_s3, %s2184_s3 }
  0x32   :  { %p2191_p8 = por %p2190_p7, %p2189_p6 }
  0x34   :  { %p2192_p9 = pnand %p2191_p8, %p2185_p5 }
  0x36   :  { %2195 = shalt.err (!%p2192_p9)
}
  0x37   :  { %70 = dma.hbm_to_vmem [thread:$0]  %s2484_s7, 8192, %s65_s16, [#allocation6], %s2228_s5, %s2228_s5, %s2229_s21  }
  0x38   :  { %s2196_s30 = scalar_lea.hbm %s2486_s9, 2048 }
  0x39   :  { %p2197_p10 = scmp.ne.s32.totalorder %s2486_s9, %s2196_s30  ;;  %p2200_p11 = scmp.lt.u32.totalorder %s2196_s30, %s2486_s9 }
  0x3b   :  { %p2202_p12 = pnand %p2200_p11, %p2197_p10 }
  0x3d   :  { %2205 = shalt.err (!%p2202_p12)
}
  0x3e   :  { %s2206_s24 = scalar_lea.vmem %s2344_s18, 2048  ;;  %p2211_p0 = scmp.lt.s32.totalorder %s2344_s18, %s2344_s18 }
  0x3f   :  { %p2207_p13 = scmp.ne.s32.totalorder %s2344_s18, %s2206_s24  ;;  %p2212_p1 = scmp.lt.s32.totalorder %s2206_s24, %s2206_s24 }
  0x41   :  { %p2213_p2 = por %p2212_p1, %p2211_p0 }
  0x43   :  { %p2214_p3 = pnand %p2213_p2, %p2207_p13 }
  0x45   :  { %2217 = shalt.err (!%p2214_p3)
}
  0x46   :  { %s2232_s7 = smov 64   ;;  %s2233_s5 = smov 4  }
  0x47   :  { %84 = dma.hbm_to_vmem [thread:$0]  %s2486_s9, 2048, %s2344_s18, [#allocation9], %s2232_s7, %s2232_s7, %s2233_s5  }
  0x48   :  { %2218 = dma.done.wait [#allocation4], 2048  }
  0x49   :  { %2219 = vsyncadd [#allocation4], 4294965248 }
  0x4a   :  { %2220 = dma.done.wait [#allocation6], 16384  }
  0x4b   :  { %2221 = vsyncadd [#allocation6], 4294950912 }
  0x4c   :  { %2222 = dma.done.wait [#allocation9], 2048  }
  0x4d   :  { %2223 = vsyncadd [#allocation9], 4294965248  ;;  %v2234_v1 = vmov 0.0   ;;  %vm2235_vm0 = vmmov 0   ;;  %vm117_vm1 = vcmask 64512   ;;  %v109_v2 = vld [vmem:[%s2478_s1] sm:$0xff] }
  0x4e   :  { %1846 = vmatprep.subr.mxu1 %v2234_v1  ;;  %1848 = vmatprep.mubr.msk.f32.mxu1 %vm2235_vm0, %v2234_v1  ;;  %v108_v3 = vld [vmem:[%s2477_s0] sm:$0xff]  ;;  %v1893_v7 = vld [vmem:[#allocation3 + $0x10] ss:$8 sps:$4 sm:$0xff]   ;;  %v2236_v20 = vmov 0   ;;  %vm1630_vm2 = vcmask 7168  }
  0x4f   :  { %1847 = vmatpush3.msra.mxu1 %v109_v2  ;;  %v1890_v4 = vld [vmem:[#allocation3] ss:$8 sps:$4 sm:$0xff]   ;;  %v1892_v5 = vld [vmem:[#allocation3 + $0x4] ss:$8 sps:$4 sm:$0xff]   ;;  %v1895_v6 = vld [vmem:[#allocation3 + $0x14] ss:$8 sps:$4 sm:$0xff]  }
  0x50   :  { %1849 = vmatmul.mubr.msk.f32.vlgmr.msra.gmra.mrb[0].mxu1 %vm117_vm1, %v108_v3  ;;  %300 = vmatprep.subr.bf16.mxu1 %v1892_v5  ;;  %v1898_v8 = vld [vmem:[#allocation3 + $0x24] ss:$8 sps:$4 sm:$0xff]   ;;  %v1896_v9 = vld [vmem:[#allocation3 + $0x20] ss:$8 sps:$4 sm:$0xff]   ;;  %v1901_v10 = vld [vmem:[#allocation3 + $0x34] ss:$8 sps:$4 sm:$0xff]  }
  0x51   :  { %301 = vmatpush1.bf16.msra.mxu1 %v1890_v4  ;;  %v1899_v11 = vld [vmem:[#allocation3 + $0x30] ss:$8 sps:$4 sm:$0xff]   ;;  %v1904_v12 = vld [vmem:[#allocation3 + $0x44] ss:$8 sps:$4 sm:$0xff]   ;;  %v1902_v13 = vld [vmem:[#allocation3 + $0x40] ss:$8 sps:$4 sm:$0xff]   ;;  %332 = vmatprep.mubr.bf16.mxu1 %v2236_v20 }
  0x52   :  { %302 = vmatprep.subr.bf16.mxu1 %v1895_v6  ;;  %v1907_v14 = vld [vmem:[#allocation3 + $0x54] ss:$8 sps:$4 sm:$0xff]   ;;  %v1905_v15 = vld [vmem:[#allocation3 + $0x50] ss:$8 sps:$4 sm:$0xff]   ;;  %v1910_v16 = vld [vmem:[#allocation3 + $0x64] ss:$8 sps:$4 sm:$0xff]  }
  0x53   :  { %v1908_v17 = vld [vmem:[#allocation3 + $0x60] ss:$8 sps:$4 sm:$0xff]   ;;  %v1913_v18 = vld [vmem:[#allocation3 + $0x74] ss:$8 sps:$4 sm:$0xff]   ;;  %v1911_v19 = vld [vmem:[#allocation3 + $0x70] ss:$8 sps:$4 sm:$0xff]  }
  0x54   :  { %v1914_v21 = vld [vmem:[#allocation5 + $0x4] ss:$16 sps:$4 sm:$0xff]   ;;  %v1918_v22 = vld [vmem:[#allocation5 + $0xc] ss:$16 sps:$4 sm:$0xff]   ;;  %v1919_v23 = vld [vmem:[#allocation5] ss:$16 sps:$4 sm:$0xff]  }
  0x55   :  { %303 = vmatpush1.bf16.msra.mxu1 %v1893_v7  ;;  %v1920_v24 = vld [vmem:[#allocation5 + $0x24] ss:$16 sps:$4 sm:$0xff]   ;;  %751 = vmatprep.subr.bf16.mxu0 %v1914_v21  ;;  %v1925_v25 = vld [vmem:[#allocation5 + $0x20] ss:$16 sps:$4 sm:$0xff]   ;;  %v1639_v50 = vld [vmem:[%s2479_s2] ss:$0 sm:$0xff] }
  0x56   :  { %304 = vmatprep.subr.bf16.mxu1 %v1898_v8  ;;  %752 = vmatpush1.bf16.msra.mxu0 %v1919_v23  ;;  %v1926_v26 = vld [vmem:[#allocation5 + $0x44] ss:$16 sps:$4 sm:$0xff]   ;;  %v1931_v27 = vld [vmem:[#allocation5 + $0x40] ss:$16 sps:$4 sm:$0xff]   ;;  %v1916_v54 = vld [vmem:[#allocation5 + $0x8] ss:$16 sps:$4 sm:$0xff]  }
  0x57   :  { %753 = vmatprep.subr.bf16.mxu0 %v1920_v24  ;;  %v1932_v28 = vld [vmem:[#allocation5 + $0x64] ss:$16 sps:$4 sm:$0xff]   ;;  %v1937_v29 = vld [vmem:[#allocation5 + $0x60] ss:$16 sps:$4 sm:$0xff]   ;;  %v1924_v56 = vld [vmem:[#allocation5 + $0x2c] ss:$16 sps:$4 sm:$0xff]  }
  0x58   :  { %v1938_v30 = vld [vmem:[#allocation5 + $0x84] ss:$16 sps:$4 sm:$0xff]   ;;  %v1943_v31 = vld [vmem:[#allocation5 + $0x80] ss:$16 sps:$4 sm:$0xff]   ;;  %v1922_v57 = vld [vmem:[#allocation5 + $0x28] ss:$16 sps:$4 sm:$0xff]  }
  0x59   :  { %305 = vmatpush1.bf16.msra.mxu1 %v1896_v9  ;;  %v1944_v32 = vld [vmem:[#allocation5 + $0xa4] ss:$16 sps:$4 sm:$0xff]   ;;  %v1949_v33 = vld [vmem:[#allocation5 + $0xa0] ss:$16 sps:$4 sm:$0xff]   ;;  %v1930_v58 = vld [vmem:[#allocation5 + $0x4c] ss:$16 sps:$4 sm:$0xff]  }
  0x5a   :  { %306 = vmatprep.subr.bf16.mxu1 %v1901_v10  ;;  %754 = vmatpush1.bf16.msra.mxu0 %v1925_v25  ;;  %v1950_v34 = vld [vmem:[#allocation5 + $0xc4] ss:$16 sps:$4 sm:$0xff]   ;;  %v1955_v35 = vld [vmem:[#allocation5 + $0xc0] ss:$16 sps:$4 sm:$0xff]   ;;  %v1928_v59 = vld [vmem:[#allocation5 + $0x48] ss:$16 sps:$4 sm:$0xff]  }
  0x5b   :  { %755 = vmatprep.subr.bf16.mxu0 %v1926_v26  ;;  %v1956_v36 = vld [vmem:[#allocation5 + $0xe4] ss:$16 sps:$4 sm:$0xff]   ;;  %v1961_v37 = vld [vmem:[#allocation5 + $0xe0] ss:$16 sps:$4 sm:$0xff]   ;;  %v1936_v60 = vld [vmem:[#allocation5 + $0x6c] ss:$16 sps:$4 sm:$0xff]  }
  0x5c   :  { %v1962_v38 = vld [vmem:[#allocation5 + $0x104] ss:$16 sps:$4 sm:$0xff]   ;;  %v1967_v39 = vld [vmem:[#allocation5 + $0x100] ss:$16 sps:$4 sm:$0xff]   ;;  %v1934_v61 = vld [vmem:[#allocation5 + $0x68] ss:$16 sps:$4 sm:$0xff]  }
  0x5d   :  { %307 = vmatpush1.bf16.msra.mxu1 %v1899_v11  ;;  %v1968_v40 = vld [vmem:[#allocation5 + $0x124] ss:$16 sps:$4 sm:$0xff]   ;;  %v1973_v41 = vld [vmem:[#allocation5 + $0x120] ss:$16 sps:$4 sm:$0xff]   ;;  %v1942_v62 = vld [vmem:[#allocation5 + $0x8c] ss:$16 sps:$4 sm:$0xff]  }
  0x5e   :  { %308 = vmatprep.subr.bf16.mxu1 %v1904_v12  ;;  %756 = vmatpush1.bf16.msra.mxu0 %v1931_v27  ;;  %v1974_v42 = vld [vmem:[#allocation5 + $0x144] ss:$16 sps:$4 sm:$0xff]   ;;  %v1979_v43 = vld [vmem:[#allocation5 + $0x140] ss:$16 sps:$4 sm:$0xff]   ;;  %v1940_v63 = vld [vmem:[#allocation5 + $0x88] ss:$16 sps:$4 sm:$0xff]  }
  0x5f   :  { %757 = vmatprep.subr.bf16.mxu0 %v1932_v28  ;;  %v1980_v44 = vld [vmem:[#allocation5 + $0x164] ss:$16 sps:$4 sm:$0xff]   ;;  %v1985_v45 = vld [vmem:[#allocation5 + $0x160] ss:$16 sps:$4 sm:$0xff]   ;;  %v1948_v0 = vld [vmem:[#allocation5 + $0xac] ss:$16 sps:$4 sm:$0xff]  }
  0x60   :  { %v1986_v46 = vld [vmem:[#allocation5 + $0x184] ss:$16 sps:$4 sm:$0xff]   ;;  %v1991_v47 = vld [vmem:[#allocation5 + $0x180] ss:$16 sps:$4 sm:$0xff]   ;;  %v1946_v2 = vld [vmem:[#allocation5 + $0xa8] ss:$16 sps:$4 sm:$0xff]  }
  0x61   :  { %309 = vmatpush1.bf16.msra.mxu1 %v1902_v13  ;;  %v1992_v48 = vld [vmem:[#allocation5 + $0x1a4] ss:$16 sps:$4 sm:$0xff]   ;;  %v1997_v49 = vld [vmem:[#allocation5 + $0x1a0] ss:$16 sps:$4 sm:$0xff]   ;;  %v1954_v3 = vld [vmem:[#allocation5 + $0xcc] ss:$16 sps:$4 sm:$0xff]  }
  0x62   :  { %310 = vmatprep.subr.bf16.mxu1 %v1907_v14  ;;  %758 = vmatpush1.bf16.msra.mxu0 %v1937_v29  ;;  %v1952_v4 = vld [vmem:[#allocation5 + $0xc8] ss:$16 sps:$4 sm:$0xff]   ;;  %v1960_v5 = vld [vmem:[#allocation5 + $0xec] ss:$16 sps:$4 sm:$0xff]   ;;  %v2003_v23 = vld [vmem:[#allocation5 + $0x1c0] ss:$16 sps:$4 sm:$0xff]   ;;  %v210_v29 = vlaneseq }
  0x63   :  { %759 = vmatprep.subr.bf16.mxu0 %v1938_v30  ;;  %v1958_v6 = vld [vmem:[#allocation5 + $0xe8] ss:$16 sps:$4 sm:$0xff]   ;;  %v1966_v7 = vld [vmem:[#allocation5 + $0x10c] ss:$16 sps:$4 sm:$0xff]   ;;  %v2004_v24 = vld [vmem:[#allocation5 + $0x1e4] ss:$16 sps:$4 sm:$0xff]  }
  0x64   :  { %v1964_v8 = vld [vmem:[#allocation5 + $0x108] ss:$16 sps:$4 sm:$0xff]   ;;  %v1972_v9 = vld [vmem:[#allocation5 + $0x12c] ss:$16 sps:$4 sm:$0xff]   ;;  %v2009_v27 = vld [vmem:[#allocation5 + $0x1e0] ss:$16 sps:$4 sm:$0xff]  }
  0x65   :  { %311 = vmatpush1.bf16.msra.mxu1 %v1905_v15  ;;  %v1970_v10 = vld [vmem:[#allocation5 + $0x128] ss:$16 sps:$4 sm:$0xff]   ;;  %v1978_v11 = vld [vmem:[#allocation5 + $0x14c] ss:$16 sps:$4 sm:$0xff]   ;;  %v2388_v30 = vshrl.u32 %v210_v29, 7 }
  0x66   :  { %312 = vmatprep.subr.bf16.mxu1 %v1910_v16  ;;  %760 = vmatpush1.bf16.msra.mxu0 %v1943_v31  ;;  %v1976_v12 = vld [vmem:[#allocation5 + $0x148] ss:$16 sps:$4 sm:$0xff]   ;;  %v1984_v13 = vld [vmem:[#allocation5 + $0x16c] ss:$16 sps:$4 sm:$0xff]  }
  0x67   :  { %761 = vmatprep.subr.bf16.mxu0 %v1944_v32  ;;  %v1982_v14 = vld [vmem:[#allocation5 + $0x168] ss:$16 sps:$4 sm:$0xff]   ;;  %v1990_v15 = vld [vmem:[#allocation5 + $0x18c] ss:$16 sps:$4 sm:$0xff]   ;;  %v2391_v31 = vsub.s32 0, %v2388_v30  ;;  %v425_v29 = vsub.s32 3, %v2388_v30 }
  0x68   :  { %v1988_v16 = vld [vmem:[#allocation5 + $0x188] ss:$16 sps:$4 sm:$0xff]   ;;  %v2002_v21 = vld [vmem:[#allocation5 + $0x1cc] ss:$16 sps:$4 sm:$0xff]  }
  0x69   :  { %313 = vmatpush1.bf16.msra.mxu1 %v1908_v17  ;;  %v1996_v17 = vld [vmem:[#allocation5 + $0x1ac] ss:$16 sps:$4 sm:$0xff]   ;;  %v2006_v26 = vld [vmem:[#allocation5 + $0x1e8] ss:$16 sps:$4 sm:$0xff]  }
  0x6a   :  { %314 = vmatprep.subr.bf16.mxu1 %v1913_v18  ;;  %762 = vmatpush1.bf16.msra.mxu0 %v1949_v33  ;;  %v1994_v18 = vld [vmem:[#allocation5 + $0x1a8] ss:$16 sps:$4 sm:$0xff]   ;;  %v2008_v25 = vld [vmem:[#allocation5 + $0x1ec] ss:$16 sps:$4 sm:$0xff]   ;;  %v2397_v33 = vsub.s32 1, %v2388_v30 }
  0x6b   :  { %763 = vmatprep.subr.bf16.mxu0 %v1950_v34  ;;  %v2012_v28 = vld [vmem:[#allocation7 + $0x4] ss:$8 sps:$4 sm:$0xff]   ;;  %v208_v32 = vld [vmem:[%s2481_s4] sm:$0x3] }
  0x6c   :  { %v213_v34 = vrot.slane %v208_v32, %v2391_v31 }
  0x6d   :  { %315 = vmatpush1.bf16.msra.mxu1 %v1911_v19  ;;  %v1998_v19 = vld [vmem:[#allocation5 + $0x1c4] ss:$16 sps:$4 sm:$0xff]  }
  0x6e   :  { %792 = vmatprep.subr.bf16.mxu1 %v1918_v22  ;;  %764 = vmatpush1.bf16.msra.mxu0 %v1955_v35  ;;  %v2000_v22 = vld [vmem:[#allocation5 + $0x1c8] ss:$16 sps:$4 sm:$0xff]   ;;  %v217_v35 = vrot.slane %v208_v32, %v2397_v33 }
  0x6f   :  { %765 = vmatprep.subr.bf16.mxu0 %v1956_v36 }
  0x72   :  { %766 = vmatpush1.bf16.msra.mxu0 %v1961_v37 }
  0x73   :  { %767 = vmatprep.subr.bf16.mxu0 %v1962_v38 }
  0x76   :  { %768 = vmatpush1.bf16.msra.mxu0 %v1967_v39 }
  0x77   :  { %769 = vmatprep.subr.bf16.mxu0 %v1968_v40 }
  0x7a   :  { %770 = vmatpush1.bf16.msra.mxu0 %v1973_v41 }
  0x7b   :  { %771 = vmatprep.subr.bf16.mxu0 %v1974_v42 }
  0x7e   :  { %772 = vmatpush1.bf16.msra.mxu0 %v1979_v43 }
  0x7f   :  { %773 = vmatprep.subr.bf16.mxu0 %v1980_v44 }
  0x82   :  { %774 = vmatpush1.bf16.msra.mxu0 %v1985_v45  ;;  %v2010_v45 = vld [vmem:[#allocation7] ss:$8 sps:$4 sm:$0xff]  }
  0x83   :  { %775 = vmatprep.subr.bf16.mxu0 %v1986_v46 }
  0x86   :  { %776 = vmatpush1.bf16.msra.mxu0 %v1991_v47  ;;  %v2015_v47 = vld [vmem:[#allocation7 + $0x14] ss:$8 sps:$4 sm:$0xff]  }
  0x87   :  { %777 = vmatprep.subr.bf16.mxu0 %v1992_v48  ;;  %v2013_v48 = vld [vmem:[#allocation7 + $0x10] ss:$8 sps:$4 sm:$0xff]  }
  0x8a   :  { %778 = vmatpush1.bf16.msra.mxu0 %v1997_v49  ;;  %v2018_v49 = vld [vmem:[#allocation7 + $0x24] ss:$8 sps:$4 sm:$0xff]  }
  0x8b   :  { %779 = vmatprep.subr.bf16.mxu0 %v1998_v19  ;;  %v2110_v19 = vld [vmem:[#allocation8 + $0x50] sm:$0xff]  }
  0x8e   :  { %780 = vmatpush1.bf16.msra.mxu0 %v2003_v23  ;;  %v2113_v23 = vld [vmem:[#allocation8 + $0x18] sm:$0xff]  }
  0x8f   :  { %781 = vmatprep.subr.bf16.mxu0 %v2004_v24  ;;  %v2114_v24 = vld [vmem:[#allocation8 + $0x60] sm:$0xff]  }
  0x92   :  { %782 = vmatpush1.bf16.msra.mxu0 %v2009_v27  ;;  %v2117_v27 = vld [vmem:[#allocation8 + $0x28] sm:$0xff]  }
  0x93   :  { %1237 = vmatprep.subr.bf16.mxu0 %v2012_v28  ;;  %v2406_v28 = vld [vmem:[%s2483_s6] sm:$0xf] }
  0x94   :  { %v414_v32 = vrot.slane %v2406_v28, %v2391_v31 }
 0x123   :  { %v187_v51 = vpop.f32.mrb[0].mxu1 }
 0x124   :  { %v188_v52 = vadd.f32 %v1639_v50, %v187_v51  ;;  %v1850_v53 = vpop.f32.mrb[1].mxu1  ;;  %v2016_v50 = vld [vmem:[#allocation7 + $0x20] ss:$8 sps:$4 sm:$0xff]   ;;  %v2021_v51 = vld [vmem:[#allocation7 + $0x34] ss:$8 sps:$4 sm:$0xff]  }
 0x125   :  { %v2024_v53 = vld [vmem:[#allocation7 + $0x44] ss:$8 sps:$4 sm:$0xff]  }
 0x126   :  { %v191_v55 = vpack.c.bf16 %v188_v52, %v188_v52  ;;  %v2019_v52 = vld [vmem:[#allocation7 + $0x30] ss:$8 sps:$4 sm:$0xff]  }
 0x128   :  { %333 = vmatmul.mubr.bf16.vlgmr.msra.gmra.mrb[4].mxu1 %v191_v55  ;;  %v2027_v55 = vld [vmem:[#allocation7 + $0x54] ss:$8 sps:$4 sm:$0xff]  }
 0x129   :  { %793 = vmatpush1.bf16.msra.mxu1 %v1916_v54  ;;  %v2022_v54 = vld [vmem:[#allocation7 + $0x40] ss:$8 sps:$4 sm:$0xff]  }
 0x12a   :  { %794 = vmatprep.subr.bf16.mxu1 %v1924_v56  ;;  %v2025_v56 = vld [vmem:[#allocation7 + $0x50] ss:$8 sps:$4 sm:$0xff]  }
 0x12d   :  { %795 = vmatpush1.bf16.msra.mxu1 %v1922_v57  ;;  %v2030_v57 = vld [vmem:[#allocation7 + $0x64] ss:$8 sps:$4 sm:$0xff]  }
 0x12e   :  { %796 = vmatprep.subr.bf16.mxu1 %v1930_v58  ;;  %v2028_v58 = vld [vmem:[#allocation7 + $0x60] ss:$8 sps:$4 sm:$0xff]  }
 0x131   :  { %797 = vmatpush1.bf16.msra.mxu1 %v1928_v59  ;;  %v2033_v59 = vld [vmem:[#allocation7 + $0x74] ss:$8 sps:$4 sm:$0xff]  }
 0x132   :  { %798 = vmatprep.subr.bf16.mxu1 %v1936_v60  ;;  %v2031_v60 = vld [vmem:[#allocation7 + $0x70] ss:$8 sps:$4 sm:$0xff]  }
 0x135   :  { %799 = vmatpush1.bf16.msra.mxu1 %v1934_v61  ;;  %v2036_v61 = vld [vmem:[#allocation7 + $0x84] ss:$8 sps:$4 sm:$0xff]  }
 0x136   :  { %800 = vmatprep.subr.bf16.mxu1 %v1942_v62  ;;  %v2034_v62 = vld [vmem:[#allocation7 + $0x80] ss:$8 sps:$4 sm:$0xff]  }
 0x139   :  { %801 = vmatpush1.bf16.msra.mxu1 %v1940_v63  ;;  %v2039_v63 = vld [vmem:[#allocation7 + $0x94] ss:$8 sps:$4 sm:$0xff]  }
 0x13a   :  { %802 = vmatprep.subr.bf16.mxu1 %v1948_v0  ;;  %v2037_v0 = vld [vmem:[#allocation7 + $0x90] ss:$8 sps:$4 sm:$0xff]  }
 0x13d   :  { %803 = vmatpush1.bf16.msra.mxu1 %v1946_v2  ;;  %v2042_v2 = vld [vmem:[#allocation7 + $0xa4] ss:$8 sps:$4 sm:$0xff]  }
 0x13e   :  { %804 = vmatprep.subr.bf16.mxu1 %v1954_v3  ;;  %v2040_v3 = vld [vmem:[#allocation7 + $0xa0] ss:$8 sps:$4 sm:$0xff]  }
 0x141   :  { %805 = vmatpush1.bf16.msra.mxu1 %v1952_v4  ;;  %v2045_v4 = vld [vmem:[#allocation7 + $0xb4] ss:$8 sps:$4 sm:$0xff]  }
 0x142   :  { %806 = vmatprep.subr.bf16.mxu1 %v1960_v5  ;;  %v2043_v5 = vld [vmem:[#allocation7 + $0xb0] ss:$8 sps:$4 sm:$0xff]  }
 0x145   :  { %807 = vmatpush1.bf16.msra.mxu1 %v1958_v6  ;;  %v2048_v6 = vld [vmem:[#allocation7 + $0xc4] ss:$8 sps:$4 sm:$0xff]  }
 0x146   :  { %808 = vmatprep.subr.bf16.mxu1 %v1966_v7  ;;  %v2046_v7 = vld [vmem:[#allocation7 + $0xc0] ss:$8 sps:$4 sm:$0xff]  }
 0x149   :  { %809 = vmatpush1.bf16.msra.mxu1 %v1964_v8  ;;  %v2051_v8 = vld [vmem:[#allocation7 + $0xd4] ss:$8 sps:$4 sm:$0xff]  }
 0x14a   :  { %810 = vmatprep.subr.bf16.mxu1 %v1972_v9  ;;  %v2049_v9 = vld [vmem:[#allocation7 + $0xd0] ss:$8 sps:$4 sm:$0xff]  }
 0x14d   :  { %811 = vmatpush1.bf16.msra.mxu1 %v1970_v10  ;;  %v2054_v10 = vld [vmem:[#allocation7 + $0xe4] ss:$8 sps:$4 sm:$0xff]  }
 0x14e   :  { %812 = vmatprep.subr.bf16.mxu1 %v1978_v11  ;;  %v2052_v11 = vld [vmem:[#allocation7 + $0xe0] ss:$8 sps:$4 sm:$0xff]  }
 0x151   :  { %813 = vmatpush1.bf16.msra.mxu1 %v1976_v12  ;;  %v2057_v12 = vld [vmem:[#allocation7 + $0xf4] ss:$8 sps:$4 sm:$0xff]  }
 0x152   :  { %814 = vmatprep.subr.bf16.mxu1 %v1984_v13  ;;  %v2055_v13 = vld [vmem:[#allocation7 + $0xf0] ss:$8 sps:$4 sm:$0xff]  }
 0x155   :  { %815 = vmatpush1.bf16.msra.mxu1 %v1982_v14  ;;  %v2060_v14 = vld [vmem:[#allocation7 + $0x104] ss:$8 sps:$4 sm:$0xff]  }
 0x156   :  { %816 = vmatprep.subr.bf16.mxu1 %v1990_v15  ;;  %v2106_v15 = vld [vmem:[#allocation8 + $0x40] sm:$0xff]  }
 0x159   :  { %817 = vmatpush1.bf16.msra.mxu1 %v1988_v16  ;;  %v2107_v16 = vld [vmem:[#allocation8] sm:$0xff]  }
 0x15a   :  { %818 = vmatprep.subr.bf16.mxu1 %v1996_v17  ;;  %v2108_v17 = vld [vmem:[#allocation8 + $0x48] sm:$0xff]  }
 0x15d   :  { %819 = vmatpush1.bf16.msra.mxu1 %v1994_v18  ;;  %v2109_v18 = vld [vmem:[#allocation8 + $0x8] sm:$0xff]  }
 0x15e   :  { %820 = vmatprep.subr.bf16.mxu1 %v2002_v21  ;;  %v2111_v21 = vld [vmem:[#allocation8 + $0x10] sm:$0xff]  }
 0x161   :  { %821 = vmatpush1.bf16.msra.mxu1 %v2000_v22  ;;  %v2112_v22 = vld [vmem:[#allocation8 + $0x58] sm:$0xff]  }
 0x162   :  { %822 = vmatprep.subr.bf16.mxu1 %v2008_v25  ;;  %v2115_v25 = vld [vmem:[#allocation8 + $0x20] sm:$0xff]  }
 0x165   :  { %823 = vmatpush1.bf16.msra.mxu1 %v2006_v26  ;;  %v2116_v26 = vld [vmem:[#allocation8 + $0x68] sm:$0xff]  }
 0x166   :  { %1815 = vmatprep.subr.bf16.mxu1 %v2106_v15  ;;  %v421_v15 = vsub.s32 2, %v2388_v30 }
 0x1fb   :  { %v334_v36 = vpop.f32.mrb[4].mxu1 }
 0x1fc   :  { %v335_v37 = vadd.f32 %v334_v36, %v213_v34  ;;  %v336_v38 = vpop.f32.mrb[5].mxu1  ;;  %v418_v34 = vrot.slane %v2406_v28, %v2397_v33 }
 0x1fd   :  { %v337_v39 = vadd.f32 %v336_v38, %v217_v35  ;;  %v338_v40 = vpop.f32.mrb[6].mxu1  ;;  %v426_v35 = vrot.slane %v2406_v28, %v425_v29  ;;  %v2121_v29 = vld [vmem:[#allocation8 + $0x38] sm:$0xff]  }
 0x1fe   :  { %v341_v41 = vpack.c.bf16 %v335_v37, %v335_v37  ;;  %v339_v42 = vpop.f32.mrb[7].mxu1 }
 0x1ff   :  { %v342_v43 = vpack.c.bf16 %v337_v39, %v337_v39 }
 0x200   :  { %v343_v46 = vmax.bf16 %v2236_v20, %v341_v41 }
 0x201   :  { %v344_v44 = vmax.bf16 %v2236_v20, %v342_v43 }
 0x203   :  { %783 = vmatprep.mubr.bf16.mxu0 %v344_v44  ;;  %824 = vmatprep.mubr.bf16.mxu1 %v344_v44 }
 0x204   :  { %784 = vmatmul.mubr.bf16.vlgmr.msra.gmra.mrb[0].mxu0 %v343_v46  ;;  %825 = vmatmul.mubr.bf16.vlgmr.msra.gmra.mrb[8].mxu1 %v343_v46 }
 0x205   :  { %1238 = vmatpush1.bf16.msra.mxu0 %v2010_v45  ;;  %1816 = vmatpush3.bf16.msra.mxu1 %v2107_v16  ;;  %v2099_v16 = vld [vmem:[#allocation7 + $0x1d4] ss:$8 sps:$4 sm:$0xff]  }
 0x206   :  { %1239 = vmatprep.subr.bf16.mxu0 %v2015_v47  ;;  %1817 = vmatprep.subr.bf16.mxu1 %v2108_v17  ;;  %v2097_v17 = vld [vmem:[#allocation7 + $0x1d0] ss:$8 sps:$4 sm:$0xff]  }
 0x209   :  { %1240 = vmatpush1.bf16.msra.mxu0 %v2013_v48  ;;  %1818 = vmatpush3.bf16.msra.mxu1 %v2109_v18  ;;  %v422_v18 = vrot.slane %v2406_v28, %v421_v15  ;;  %v2120_v28 = vld [vmem:[#allocation8 + $0x78] sm:$0xff]  }
 0x20a   :  { %1241 = vmatprep.subr.bf16.mxu0 %v2018_v49  ;;  %1819 = vmatprep.subr.bf16.mxu1 %v2110_v19  ;;  %v2102_v19 = vld [vmem:[#allocation7 + $0x1e4] ss:$8 sps:$4 sm:$0xff]  }
 0x20d   :  { %1242 = vmatpush1.bf16.msra.mxu0 %v2016_v50  ;;  %1820 = vmatpush3.bf16.msra.mxu1 %v2111_v21  ;;  %v2100_v21 = vld [vmem:[#allocation7 + $0x1e0] ss:$8 sps:$4 sm:$0xff]  }
 0x20e   :  { %1243 = vmatprep.subr.bf16.mxu0 %v2021_v51  ;;  %1821 = vmatprep.subr.bf16.mxu1 %v2112_v22  ;;  %v2058_v51 = vld [vmem:[#allocation7 + $0x100] ss:$8 sps:$4 sm:$0xff]  }
 0x211   :  { %1244 = vmatpush1.bf16.msra.mxu0 %v2019_v52  ;;  %1822 = vmatpush3.bf16.msra.mxu1 %v2113_v23  ;;  %v2105_v23 = vld [vmem:[#allocation7 + $0x1f4] ss:$8 sps:$4 sm:$0xff]  }
 0x212   :  { %1245 = vmatprep.subr.bf16.mxu0 %v2024_v53  ;;  %1823 = vmatprep.subr.bf16.mxu1 %v2114_v24  ;;  %v2063_v53 = vld [vmem:[#allocation7 + $0x114] ss:$8 sps:$4 sm:$0xff]   ;;  %v2103_v24 = vld [vmem:[#allocation7 + $0x1f0] ss:$8 sps:$4 sm:$0xff]  }
 0x215   :  { %1246 = vmatpush1.bf16.msra.mxu0 %v2022_v54  ;;  %1824 = vmatpush3.bf16.msra.mxu1 %v2115_v25 }
 0x216   :  { %1247 = vmatprep.subr.bf16.mxu0 %v2027_v55  ;;  %1825 = vmatprep.subr.bf16.mxu1 %v2116_v26  ;;  %v2061_v55 = vld [vmem:[#allocation7 + $0x110] ss:$8 sps:$4 sm:$0xff]  }
 0x217   :  { %v2118_v26 = vld [vmem:[#allocation8 + $0x70] sm:$0xff]  }
 0x219   :  { %1248 = vmatpush1.bf16.msra.mxu0 %v2025_v56  ;;  %1826 = vmatpush3.bf16.msra.mxu1 %v2117_v27  ;;  %v2066_v56 = vld [vmem:[#allocation7 + $0x124] ss:$8 sps:$4 sm:$0xff]   ;;  %v2119_v27 = vld [vmem:[#allocation8 + $0x30] sm:$0xff]  }
 0x21a   :  { %1249 = vmatprep.subr.bf16.mxu0 %v2030_v57  ;;  %v2064_v57 = vld [vmem:[#allocation7 + $0x120] ss:$8 sps:$4 sm:$0xff]   ;;  %1827 = vmatprep.subr.bf16.mxu1 %v2118_v26 }
 0x21d   :  { %1250 = vmatpush1.bf16.msra.mxu0 %v2028_v58  ;;  %v2069_v58 = vld [vmem:[#allocation7 + $0x134] ss:$8 sps:$4 sm:$0xff]   ;;  %1828 = vmatpush3.bf16.msra.mxu1 %v2119_v27 }
 0x21e   :  { %1251 = vmatprep.subr.bf16.mxu0 %v2033_v59  ;;  %v2067_v59 = vld [vmem:[#allocation7 + $0x130] ss:$8 sps:$4 sm:$0xff]   ;;  %1829 = vmatprep.subr.bf16.mxu1 %v2120_v28 }
 0x221   :  { %1252 = vmatpush1.bf16.msra.mxu0 %v2031_v60  ;;  %v2072_v60 = vld [vmem:[#allocation7 + $0x144] ss:$8 sps:$4 sm:$0xff]   ;;  %1830 = vmatpush3.bf16.msra.mxu1 %v2121_v29 }
 0x222   :  { %1253 = vmatprep.subr.bf16.mxu0 %v2036_v61  ;;  %v2070_v61 = vld [vmem:[#allocation7 + $0x140] ss:$8 sps:$4 sm:$0xff]   ;;  %1851 = vmatprep.subr.bf16.mxu1 %v2234_v1 }
 0x225   :  { %1254 = vmatpush1.bf16.msra.mxu0 %v2034_v62  ;;  %v2075_v62 = vld [vmem:[#allocation7 + $0x154] ss:$8 sps:$4 sm:$0xff]  }
 0x226   :  { %1255 = vmatprep.subr.bf16.mxu0 %v2039_v63  ;;  %v2073_v63 = vld [vmem:[#allocation7 + $0x150] ss:$8 sps:$4 sm:$0xff]  }
 0x229   :  { %1256 = vmatpush1.bf16.msra.mxu0 %v2037_v0  ;;  %v2078_v0 = vld [vmem:[#allocation7 + $0x164] ss:$8 sps:$4 sm:$0xff]  }
 0x22a   :  { %1257 = vmatprep.subr.bf16.mxu0 %v2042_v2  ;;  %v2076_v2 = vld [vmem:[#allocation7 + $0x160] ss:$8 sps:$4 sm:$0xff]  }
 0x22d   :  { %1258 = vmatpush1.bf16.msra.mxu0 %v2040_v3  ;;  %v2081_v3 = vld [vmem:[#allocation7 + $0x174] ss:$8 sps:$4 sm:$0xff]  }
 0x22e   :  { %1259 = vmatprep.subr.bf16.mxu0 %v2045_v4  ;;  %v2079_v4 = vld [vmem:[#allocation7 + $0x170] ss:$8 sps:$4 sm:$0xff]  }
 0x231   :  { %1260 = vmatpush1.bf16.msra.mxu0 %v2043_v5  ;;  %v2084_v5 = vld [vmem:[#allocation7 + $0x184] ss:$8 sps:$4 sm:$0xff]  }
 0x232   :  { %1261 = vmatprep.subr.bf16.mxu0 %v2048_v6  ;;  %v2082_v6 = vld [vmem:[#allocation7 + $0x180] ss:$8 sps:$4 sm:$0xff]  }
 0x235   :  { %1262 = vmatpush1.bf16.msra.mxu0 %v2046_v7  ;;  %v2087_v7 = vld [vmem:[#allocation7 + $0x194] ss:$8 sps:$4 sm:$0xff]  }
 0x236   :  { %1263 = vmatprep.subr.bf16.mxu0 %v2051_v8  ;;  %v2085_v8 = vld [vmem:[#allocation7 + $0x190] ss:$8 sps:$4 sm:$0xff]  }
 0x239   :  { %1264 = vmatpush1.bf16.msra.mxu0 %v2049_v9  ;;  %v2090_v9 = vld [vmem:[#allocation7 + $0x1a4] ss:$8 sps:$4 sm:$0xff]  }
 0x23a   :  { %1265 = vmatprep.subr.bf16.mxu0 %v2054_v10  ;;  %v2088_v10 = vld [vmem:[#allocation7 + $0x1a0] ss:$8 sps:$4 sm:$0xff]  }
 0x23d   :  { %1266 = vmatpush1.bf16.msra.mxu0 %v2052_v11  ;;  %v2093_v11 = vld [vmem:[#allocation7 + $0x1b4] ss:$8 sps:$4 sm:$0xff]  }
 0x23e   :  { %1267 = vmatprep.subr.bf16.mxu0 %v2057_v12  ;;  %v2091_v12 = vld [vmem:[#allocation7 + $0x1b0] ss:$8 sps:$4 sm:$0xff]  }
 0x241   :  { %1268 = vmatpush1.bf16.msra.mxu0 %v2055_v13  ;;  %v2096_v13 = vld [vmem:[#allocation7 + $0x1c4] ss:$8 sps:$4 sm:$0xff]  }
 0x242   :  { %1278 = vmatprep.subr.bf16.mxu0 %v2060_v14  ;;  %v2094_v14 = vld [vmem:[#allocation7 + $0x1c0] ss:$8 sps:$4 sm:$0xff]  }
 0x2d7   :  { %v785_v36 = vpop.f32.mrb[0].mxu0  ;;  %v2414_v37 = vpop.f32.mrb[8].mxu1 }
 0x2d8   :  { %v786_v38 = vadd.f32 %v785_v36, %v414_v32  ;;  %v787_v39 = vpop.f32.mrb[1].mxu0  ;;  %v828_v40 = vpop.f32.mrb[9].mxu1  ;;  %v827_v22 = vadd.f32 %v2414_v37, %v422_v18  ;;  %v905_v32 = vld [vmem:[%s2485_s8] sm:$0x3] }
 0x2d9   :  { %v788_v41 = vadd.f32 %v787_v39, %v418_v34  ;;  %v829_v42 = vadd.f32 %v828_v40, %v426_v35  ;;  %v789_v43 = vpop.f32.mrb[2].mxu0  ;;  %v830_v44 = vpop.f32.mrb[10].mxu1  ;;  %v910_v34 = vrot.slane %v905_v32, %v2391_v31  ;;  %v914_v35 = vrot.slane %v905_v32, %v2397_v33  ;;  %v2123_v31 = vld [vmem:[%s2488_s11 + $0x8] sm:$0xff]   ;;  %v2124_v33 = vld [vmem:[%s2488_s11 + $0x10] sm:$0xff]  }
 0x2da   :  { %v833_v45 = vpack.c.bf16 %v786_v38, %v786_v38  ;;  %v790_v46 = vpop.f32.mrb[3].mxu0  ;;  %v831_v47 = vpop.f32.mrb[11].mxu1  ;;  %v835_v25 = vpack.c.bf16 %v827_v22, %v827_v22 }
 0x2db   :  { %v834_v48 = vpack.c.bf16 %v788_v41, %v788_v41  ;;  %v836_v49 = vpack.c.bf16 %v829_v42, %v829_v42  ;;  %v2125_v47 = vld [vmem:[%s2488_s11 + $0x18] sm:$0xff]  }
 0x2dc   :  { %v837_v52 = vmax.bf16 %v2236_v20, %v833_v45  ;;  %v839_v30 = vmax.bf16 %v2236_v20, %v835_v25  ;;  %v2122_v45 = vld [vmem:[%s2488_s11] sm:$0xff]  }
 0x2dd   :  { %v838_v50 = vmax.bf16 %v2236_v20, %v834_v48  ;;  %v840_v54 = vmax.bf16 %v2236_v20, %v836_v49  ;;  %v2126_v48 = vld [vmem:[%s2488_s11 + $0x20] sm:$0xff]   ;;  %v2127_v49 = vld [vmem:[%s2488_s11 + $0x28] sm:$0xff]  }
 0x2df   :  { %1269 = vmatprep.mubr.bf16.mxu0 %v838_v50  ;;  %v2128_v50 = vld [vmem:[%s2488_s11 + $0x30] sm:$0xff]  }
 0x2e0   :  { %1270 = vmatmul.mubr.bf16.vlgmr.msra.gmra.mrb[4].mxu0 %v837_v52 }
 0x2e1   :  { %1279 = vmatpush1.bf16.msra.mxu0 %v2058_v51  ;;  %1310 = vmatprep.mubr.bf16.mxu0 %v840_v54  ;;  %v2129_v51 = vld [vmem:[%s2488_s11 + $0x38] sm:$0xff]  }
 0x2e2   :  { %1280 = vmatprep.subr.bf16.mxu0 %v2063_v53  ;;  %v1785_v53 = vld [vmem:[%s2487_s10] ss:$0 sm:$0xff] }
 0x2e5   :  { %1281 = vmatpush1.bf16.msra.mxu0 %v2061_v55 }
 0x2e6   :  { %1282 = vmatprep.subr.bf16.mxu0 %v2066_v56 }
 0x2e9   :  { %1283 = vmatpush1.bf16.msra.mxu0 %v2064_v57 }
 0x2ea   :  { %1284 = vmatprep.subr.bf16.mxu0 %v2069_v58 }
 0x2ed   :  { %1285 = vmatpush1.bf16.msra.mxu0 %v2067_v59 }
 0x2ee   :  { %1286 = vmatprep.subr.bf16.mxu0 %v2072_v60 }
 0x2f1   :  { %1287 = vmatpush1.bf16.msra.mxu0 %v2070_v61 }
 0x2f2   :  { %1288 = vmatprep.subr.bf16.mxu0 %v2075_v62 }
 0x2f5   :  { %1289 = vmatpush1.bf16.msra.mxu0 %v2073_v63 }
 0x2f6   :  { %1290 = vmatprep.subr.bf16.mxu0 %v2078_v0 }
 0x2f9   :  { %1291 = vmatpush1.bf16.msra.mxu0 %v2076_v2  ;;  %v1811_v2 = vld [vmem:[%s2490_s13] ss:$0 sm:$0xff] }
 0x2fa   :  { %1292 = vmatprep.subr.bf16.mxu0 %v2081_v3 }
 0x2fd   :  { %1293 = vmatpush1.bf16.msra.mxu0 %v2079_v4 }
 0x2fe   :  { %1294 = vmatprep.subr.bf16.mxu0 %v2084_v5 }
 0x301   :  { %1295 = vmatpush1.bf16.msra.mxu0 %v2082_v6  ;;  %v1812_v6 = vld [vmem:[#allocation2] ss:$0 sm:$0xff] }
 0x302   :  { %1296 = vmatprep.subr.bf16.mxu0 %v2087_v7 }
 0x305   :  { %1297 = vmatpush1.bf16.msra.mxu0 %v2085_v8 }
 0x306   :  { %1298 = vmatprep.subr.bf16.mxu0 %v2090_v9 }
 0x309   :  { %1299 = vmatpush1.bf16.msra.mxu0 %v2088_v10 }
 0x30a   :  { %1300 = vmatprep.subr.bf16.mxu0 %v2093_v11 }
 0x30d   :  { %1301 = vmatpush1.bf16.msra.mxu0 %v2091_v12 }
 0x30e   :  { %1302 = vmatprep.subr.bf16.mxu0 %v2096_v13 }
 0x311   :  { %1303 = vmatpush1.bf16.msra.mxu0 %v2094_v14 }
 0x312   :  { %1304 = vmatprep.subr.bf16.mxu0 %v2099_v16 }
 0x315   :  { %1305 = vmatpush1.bf16.msra.mxu0 %v2097_v17 }
 0x316   :  { %1306 = vmatprep.subr.bf16.mxu0 %v2102_v19 }
 0x319   :  { %1307 = vmatpush1.bf16.msra.mxu0 %v2100_v21 }
 0x31a   :  { %1308 = vmatprep.subr.bf16.mxu0 %v2105_v23 }
 0x31d   :  { %1309 = vmatpush1.bf16.msra.mxu0 %v2103_v24 }
 0x320   :  { %1311 = vmatmul.mubr.bf16.vlgmr.msra.gmra.mrb[4].mxu0 %v839_v30 }
 0x3f3   :  { %v1312_v36 = vpop.f32.mrb[4].mxu0 }
 0x3f4   :  { %v1871_v37 = vadd.f32 %v1312_v36, %v910_v34  ;;  %v1314_v38 = vpop.f32.mrb[5].mxu0 }
 0x3f5   :  { %v1872_v39 = vadd.f32 %v1314_v38, %v914_v35  ;;  %v1316_v40 = vpop.f32.mrb[6].mxu0 }
 0x3f6   :  { %v1319_v41 = vpack.c.bf16 %v1871_v37, %v1871_v37  ;;  %v1317_v42 = vpop.f32.mrb[7].mxu0 }
 0x3f7   :  { %v1320_v43 = vpack.c.bf16 %v1872_v39, %v1872_v39 }
 0x3f8   :  { %v1321_v46 = vmax.bf16 %v2236_v20, %v1319_v41 }
 0x3f9   :  { %v1322_v44 = vmax.bf16 %v2236_v20, %v1320_v43 }
 0x3fb   :  { %1490 = vmatprep.mubr.bf16.mxu1 %v1322_v44 }
 0x3fc   :  { %1491 = vmatmul.mubr.bf16.vlgmr.msra.gmra.mrb[12].mxu1 %v1321_v46 }
 0x3fd   :  { %1852 = vmatpush3.bf16.msra.mxu1 %v2122_v45  ;;  %1867 = vmatprep.mubr.msk.bf16.mxu1 %vm2235_vm0, %v2234_v1 }
 0x3fe   :  { %1853 = vmatprep.subr.bf16.mxu1 %v2234_v1 }
 0x401   :  { %1854 = vmatpush3.bf16.msra.mxu1 %v2123_v31 }
 0x402   :  { %1855 = vmatprep.subr.bf16.mxu1 %v2234_v1 }
 0x405   :  { %1856 = vmatpush3.bf16.msra.mxu1 %v2124_v33 }
 0x406   :  { %1857 = vmatprep.subr.bf16.mxu1 %v2234_v1 }
 0x409   :  { %1858 = vmatpush3.bf16.msra.mxu1 %v2125_v47 }
 0x40a   :  { %1859 = vmatprep.subr.bf16.mxu1 %v2234_v1 }
 0x40d   :  { %1860 = vmatpush3.bf16.msra.mxu1 %v2126_v48 }
 0x40e   :  { %1861 = vmatprep.subr.bf16.mxu1 %v2234_v1 }
 0x411   :  { %1862 = vmatpush3.bf16.msra.mxu1 %v2127_v49 }
 0x412   :  { %1863 = vmatprep.subr.bf16.mxu1 %v2234_v1 }
 0x415   :  { %1864 = vmatpush3.bf16.msra.mxu1 %v2128_v50 }
 0x416   :  { %1865 = vmatprep.subr.bf16.mxu1 %v2234_v1  ;;  %v1802_v1 = vld [vmem:[%s2489_s12] ss:$0 sm:$0xff] }
 0x419   :  { %1866 = vmatpush3.bf16.msra.mxu1 %v2129_v51 }
 0x4cf   :  { %v1831_v52 = vpop.f32.mrb[12].mxu1 }
 0x4d0   :  { %v1832_v54 = vpop.f32.mrb[13].mxu1 }
 0x4d1   :  { %v1833_v55 = vadd.f32 %v1832_v54, %v1831_v52  ;;  %v1834_v56 = vpop.f32.mrb[14].mxu1 }
 0x4d2   :  { %v1835_v57 = vpop.f32.mrb[15].mxu1 }
 0x4d3   :  { %v1493_v58 = vadd.f32 %v1833_v55, %v1785_v53 }
 0x4d5   :  { %v1498_v59 = vpack.c.bf16 %v1493_v58, %v1493_v58 }
 0x4d7   :  { %v1499_v60 = vmax.bf16 %v2236_v20, %v1498_v59 }
 0x4d9   :  { %1868 = vmatmul.mubr.bf16.vlgmr.msra.gmra.mrb[16].mxu1 %v1499_v60 }
 0x5ac   :  { %v1605_v61 = vpop.f32.mrb[16].mxu1 }
 0x5ad   :  { %v1606_v62 = vadd.f32 %v1802_v1, %v1605_v61  ;;  %v1869_v63 = vpop.f32.mrb[17].mxu1 }
 0x5ae   :  { %v1608_v0 = vpop.f32.mrb[18].mxu1 }
 0x5af   :  { %v1611_v3 = vmax.f32 %v1606_v62, 0.0  ;;  %v1870_v4 = vpop.f32.mrb[19].mxu1 }
 0x5b1   :  { %v1619_v5 = vmul.f32 %v1811_v2, %v1611_v3 }
 0x5b3   :  { %1620 = vadd.xlane.f32.xlu0 %v1619_v5 }
 0x640   :  { %v1621_v7 = vpop.xlane.xlu0 %1620 }
 0x641   :  { %v1629_v20 = vadd.f32 %v1812_v6, %v1621_v7 }
 0x643   :  { %1631 = vst.msk [vmem:[%s2492_s15] sm:$0xff] %vm1630_vm2, %v1629_v20 }
 0x644   :  { %1636 = vsyncpa [#allocation4], 1 }
 0x645   :  { %1637 = vsyncpa [#allocation6], 1 }
 0x646   :  { %1638 = vsyncpa [#allocation9], 1 }

</bundles_post_ra>
